<compile_context>
chip_gen: v5e
topology: v5e:2x2
jax: 0.10.0
libtpu: 0.0.40
codegen_flags: <defaults>
</compile_context>

<pallas_src>
import functools
import math

import jax
import jax.numpy as jnp
from jax.experimental import pallas as pl
from jax.experimental.pallas import tpu as pltpu


# ----------------------------------------------------------------------------
# helpers
# ----------------------------------------------------------------------------
def _round_up(x, m):
    return ((x + m - 1) // m) * m


def _pick_tile(total, cap, align):
    """Largest multiple of `align` that divides `total` and is <= cap."""
    best = align
    t = align
    while t <= min(cap, total):
        if total % t == 0:
            best = t
        t += align
    return best


def _layernorm_rows(y, g, b, d_actual, d_pad, eps=1e-5):
    """Row LayerNorm over the first `d_actual` lanes of a (rows, d_pad) block."""
    if d_actual == d_pad:
        mu = jnp.mean(y, axis=-1, keepdims=True)
        diff = y - mu
        var = jnp.mean(diff * diff, axis=-1, keepdims=True)
    else:
        lane = jax.lax.broadcasted_iota(jnp.int32, y.shape, 1)
        valid = lane < d_actual
        inv_d = 1.0 / float(d_actual)
        mu = jnp.sum(jnp.where(valid, y, 0.0), axis=-1, keepdims=True) * inv_d
        diff = jnp.where(valid, y - mu, 0.0)
        var = jnp.sum(diff * diff, axis=-1, keepdims=True) * inv_d
    return diff * jax.lax.rsqrt(var + eps) * g + b


# ----------------------------------------------------------------------------
# fused FFN kernel
# ----------------------------------------------------------------------------
def _ffn_fused_kernel(x_ref, w1_ref, b1_ref, w2_ref, b2_ref, g_ref, bt_ref,
                      o_ref, acc_ref, *, d_model, d_pad, normalize_before):
    j = pl.program_id(1)

    @pl.when(j == 0)
    def _init():
        acc_ref[...] = jnp.zeros_like(acc_ref)

    x = x_ref[...].astype(jnp.float32)                      # (tm, d_pad)

    if normalize_before:
        src = _layernorm_rows(x, g_ref[...], bt_ref[...], d_model, d_pad)
    else:
        src = x

    # linear1 tile: (tm, d_pad) @ (d_pad, tdff) + b1  -> ReLU  (stays in VMEM/vregs)
    h = jnp.dot(src, w1_ref[...], preferred_element_type=jnp.float32)
    h = jnp.maximum(h + b1_ref[...], 0.0)
    # linear2 partial: (tm, tdff) @ (tdff, d_pad), accumulated across the Dff grid axis
    acc_ref[...] += jnp.dot(h, w2_ref[...], preferred_element_type=jnp.float32)

    @pl.when(j == pl.num_programs(1) - 1)
    def _finalize():
        y = x + acc_ref[...] + b2_ref[...]                  # residual + bias2
        if not normalize_before:
            y = _layernorm_rows(y, g_ref[...], bt_ref[...], d_model, d_pad)
        o_ref[...] = y.astype(o_ref.dtype)


def prepare_ffn_params(w1, b1, w2, b2, gamma, beta):
    """Pre-transpose / zero-pad torch-layout params once.

    torch layouts: w1 (Dff, D), b1 (Dff,), w2 (D, Dff), b2 (D,), gamma/beta (D,).
    Stored as:     w1t (D_pad, Dff_pad), w2t (Dff_pad, D_pad), vectors as (1, pad).
    """
    dff, d = w1.shape
    d_pad = _round_up(d, 128)
    dff_pad = _round_up(dff, 128)
    f32 = jnp.float32
    w1t = jnp.zeros((d_pad, dff_pad), f32).at[:d, :dff].set(w1.T.astype(f32))
    b1p = jnp.zeros((1, dff_pad), f32).at[0, :dff].set(b1.astype(f32))
    w2t = jnp.zeros((dff_pad, d_pad), f32).at[:dff, :d].set(w2.T.astype(f32))
    b2p = jnp.zeros((1, d_pad), f32).at[0, :d].set(b2.astype(f32))
    gp = jnp.zeros((1, d_pad), f32).at[0, :d].set(gamma.astype(f32))
    bp = jnp.zeros((1, d_pad), f32).at[0, :d].set(beta.astype(f32))
    return dict(w1t=w1t, b1=b1p, w2t=w2t, b2=b2p, gamma=gp, beta=bp,
                d_model=d, dff=dff)


def ffn_layer(tgt, params, *, normalize_before=False, tm_cap=256, tdff_cap=512):
    """tgt: (..., d_model)  ->  same shape.  Single fused Pallas kernel."""
    lead = tgt.shape[:-1]
    d = tgt.shape[-1]
    assert d == params["d_model"]
    d_pad = params["w1t"].shape[0]
    dff_pad = params["w1t"].shape[1]

    x2 = tgt.reshape(-1, d)
    rows = x2.shape[0]

    # tile sizes (conservative caps fit the smallest scoped-VMEM default, v5e 16 MiB)
    tm = min(tm_cap, _round_up(rows, 8))
    rows_pad = _round_up(rows, tm)
    tdff = _pick_tile(dff_pad, tdff_cap, 128)

    if rows_pad == rows and d_pad == d:
        xp = x2
    else:
        xp = jnp.zeros((rows_pad, d_pad), tgt.dtype).at[:rows, :d].set(x2)

    grid = (rows_pad // tm, dff_pad // tdff)

    out = pl.pallas_call(
        functools.partial(_ffn_fused_kernel, d_model=d, d_pad=d_pad,
                          normalize_before=normalize_before),
        grid=grid,
        in_specs=[
            pl.BlockSpec((tm, d_pad), lambda i, j: (i, 0)),       # x (resident over j)
            pl.BlockSpec((d_pad, tdff), lambda i, j: (0, j)),     # W1^T tile
            pl.BlockSpec((1, tdff), lambda i, j: (0, j)),         # b1 tile
            pl.BlockSpec((tdff, d_pad), lambda i, j: (j, 0)),     # W2^T tile
            pl.BlockSpec((1, d_pad), lambda i, j: (0, 0)),        # b2
            pl.BlockSpec((1, d_pad), lambda i, j: (0, 0)),        # LN gamma
            pl.BlockSpec((1, d_pad), lambda i, j: (0, 0)),        # LN beta
        ],
        out_specs=pl.BlockSpec((tm, d_pad), lambda i, j: (i, 0)),
        out_shape=jax.ShapeDtypeStruct((rows_pad, d_pad), tgt.dtype),
        scratch_shapes=[pltpu.VMEM((tm, d_pad), jnp.float32)],
        compiler_params=pltpu.CompilerParams(
            dimension_semantics=("parallel", "arbitrary")),
    )(xp, params["w1t"], params["b1"], params["w2t"], params["b2"],
      params["gamma"], params["beta"])

    return out[:rows, :d].reshape(*lead, d)


# ----------------------------------------------------------------------------
# pure-JAX reference (mirrors the PyTorch module, dropout = 0)
# ----------------------------------------------------------------------------
def ffn_ref(tgt, w1, b1, w2, b2, gamma, beta, normalize_before=False):
    def ln(x):
        mu = jnp.mean(x, axis=-1, keepdims=True)
        var = jnp.mean((x - mu) ** 2, axis=-1, keepdims=True)
        return (x - mu) / jnp.sqrt(var + 1e-5) * gamma + beta

    if normalize_before:
        t2 = ln(tgt)
        t2 = jnp.maximum(t2 @ w1.T + b1, 0.0) @ w2.T + b2
        return tgt + t2
    t2 = jnp.maximum(tgt @ w1.T + b1, 0.0) @ w2.T + b2
    return ln(tgt + t2)


# ----------------------------------------------------------------------------
if __name__ == "__main__":
    # Small shapes consistent with the decoder's FFNLayer usage: tgt is (seq, batch, d_model)
    L, B, D, DFF = 8, 2, 32, 64

    key = jax.random.PRNGKey(0)
    k_t, k_w1, k_b1, k_w2, k_b2 = jax.random.split(key, 5)

    tgt = jax.random.normal(k_t, (L, B, D), jnp.float32)

    # xavier_uniform for weight matrices (matches _reset_parameters), small random biases
    bound1 = math.sqrt(6.0 / (D + DFF))
    bound2 = math.sqrt(6.0 / (DFF + D))
    w1 = jax.random.uniform(k_w1, (DFF, D), jnp.float32, -bound1, bound1)
    b1 = jax.random.uniform(k_b1, (DFF,), jnp.float32, -0.1, 0.1)
    w2 = jax.random.uniform(k_w2, (D, DFF), jnp.float32, -bound2, bound2)
    b2 = jax.random.uniform(k_b2, (D,), jnp.float32, -0.1, 0.1)
    gamma = jnp.ones((D,), jnp.float32)
    beta = jnp.zeros((D,), jnp.float32)

    params = prepare_ffn_params(w1, b1, w2, b2, gamma, beta)

    # default FFNLayer: normalize_before=False (forward_post), dropout=0.0
    out = ffn_layer(tgt, params, normalize_before=False)
    out = jax.block_until_ready(out)

    ref = ffn_ref(tgt, w1, b1, w2, b2, gamma, beta, normalize_before=False)
    assert out.shape == (L, B, D)
    assert jnp.allclose(out, ref, rtol=1e-4, atol=1e-4), (
        float(jnp.max(jnp.abs(out - ref))))

    # also exercise the pre-norm path once (forward_pre)
    out_pre = jax.block_until_ready(ffn_layer(tgt, params, normalize_before=True))
    ref_pre = ffn_ref(tgt, w1, b1, w2, b2, gamma, beta, normalize_before=True)
    assert jnp.allclose(out_pre, ref_pre, rtol=1e-4, atol=1e-4)

    print("KERNEL_OK")
</pallas_src>

<mosaic_0001>
module attributes {stable_mosaic.version = 11 : i64} {
  func.func @_ffn_fused_kernel(%arg0: i32, %arg1: i32, %arg2: memref<16x128xf32, #tpu.memory_space<vmem>>, %arg3: memref<128x128xf32, #tpu.memory_space<vmem>>, %arg4: memref<1x128xf32, #tpu.memory_space<vmem>>, %arg5: memref<128x128xf32, #tpu.memory_space<vmem>>, %arg6: memref<1x128xf32, #tpu.memory_space<vmem>>, %arg7: memref<1x128xf32, #tpu.memory_space<vmem>>, %arg8: memref<1x128xf32, #tpu.memory_space<vmem>>, %arg9: memref<16x128xf32, #tpu.memory_space<vmem>>, %arg10: memref<16x128xf32, #tpu.memory_space<vmem>>) attributes {dimension_semantics = [#tpu.dimension_semantics<parallel>, #tpu.dimension_semantics<arbitrary>], iteration_bounds = array<i64: 1, 1>, scalar_prefetch = 0 : i64, scratch_operands = 1 : i64, tpu.core_type = #tpu.core_type<tc>, window_params = [{transform_indices = @transform_0, window_bounds = array<i64: 16, 128>}, {transform_indices = @transform_1, window_bounds = array<i64: 128, 128>}, {transform_indices = @transform_2, window_bounds = array<i64: 1, 128>}, {transform_indices = @transform_3, window_bounds = array<i64: 128, 128>}, {pipeline_mode = #tpu.pipeline_mode<synchronous>, transform_indices = @transform_4, window_bounds = array<i64: 1, 128>}, {pipeline_mode = #tpu.pipeline_mode<synchronous>, transform_indices = @transform_5, window_bounds = array<i64: 1, 128>}, {pipeline_mode = #tpu.pipeline_mode<synchronous>, transform_indices = @transform_6, window_bounds = array<i64: 1, 128>}, {transform_indices = @transform_7, window_bounds = array<i64: 16, 128>}]} {
    %c0_i32 = arith.constant 0 : i32
    %0 = arith.cmpi eq, %arg1, %c0_i32 : i32
    %1 = arith.extui %0 : i1 to i32
    %c0_i32_0 = arith.constant 0 : i32
    %2 = arith.cmpi ne, %1, %c0_i32_0 : i32
    scf.if %2 {
      %cst_16 = arith.constant 0.000000e+00 : f32
      %19 = vector.broadcast %cst_16 : f32 to vector<16x128xf32>
      %c0_17 = arith.constant 0 : index
      %c0_18 = arith.constant 0 : index
      %20 = vector.load %arg10[%c0_17, %c0_18] : memref<16x128xf32, #tpu.memory_space<vmem>>, vector<16x128xf32>
      tpu.vector_store %arg10[%c0_17, %c0_18], %19 {strides = array<i32>} : memref<16x128xf32, #tpu.memory_space<vmem>>, vector<16x128xf32>,
    } else {
    }
    %c0 = arith.constant 0 : index
    %c0_1 = arith.constant 0 : index
    %3 = vector.load %arg2[%c0, %c0_1] : memref<16x128xf32, #tpu.memory_space<vmem>>, vector<16x128xf32>
    %c0_2 = arith.constant 0 : index
    %c0_3 = arith.constant 0 : index
    %4 = vector.load %arg3[%c0_2, %c0_3] : memref<128x128xf32, #tpu.memory_space<vmem>>, vector<128x128xf32>
    %cst = arith.constant dense<0.000000e+00> : vector<16x128xf32>
    %5 = tpu.matmul %3, %4, %cst {dimension_numbers = #tpu.dot_dimension_numbers<[1], [0], [0], [1], [0, 0, 1, 1], [], []>} : vector<16x128xf32>, vector<128x128xf32>, vector<16x128xf32> -> vector<16x128xf32>
    %c0_4 = arith.constant 0 : index
    %c0_5 = arith.constant 0 : index
    %6 = vector.load %arg4[%c0_4, %c0_5] : memref<1x128xf32, #tpu.memory_space<vmem>>, vector<1x128xf32>
    %7 = vector.broadcast %6 : vector<1x128xf32> to vector<16x128xf32>
    %8 = arith.addf %5, %7 : vector<16x128xf32>
    %cst_6 = arith.constant 0.000000e+00 : f32
    %9 = vector.broadcast %cst_6 : f32 to vector<16x128xf32>
    %10 = arith.maximumf %8, %9 : vector<16x128xf32>
    %c0_7 = arith.constant 0 : index
    %c0_8 = arith.constant 0 : index
    %11 = vector.load %arg10[%c0_7, %c0_8] : memref<16x128xf32, #tpu.memory_space<vmem>>, vector<16x128xf32>
    %c0_9 = arith.constant 0 : index
    %c0_10 = arith.constant 0 : index
    %12 = vector.load %arg5[%c0_9, %c0_10] : memref<128x128xf32, #tpu.memory_space<vmem>>, vector<128x128xf32>
    %cst_11 = arith.constant dense<0.000000e+00> : vector<16x128xf32>
    %13 = tpu.matmul %10, %12, %cst_11 {dimension_numbers = #tpu.dot_dimension_numbers<[1], [0], [0], [1], [0, 0, 1, 1], [], []>} : vector<16x128xf32>, vector<128x128xf32>, vector<16x128xf32> -> vector<16x128xf32>
    %14 = arith.addf %11, %13 : vector<16x128xf32>
    %c0_12 = arith.constant 0 : index
    %c0_13 = arith.constant 0 : index
    %15 = vector.load %arg10[%c0_12, %c0_13] : memref<16x128xf32, #tpu.memory_space<vmem>>, vector<16x128xf32>
    tpu.vector_store %arg10[%c0_12, %c0_13], %14 {strides = array<i32>} : memref<16x128xf32, #tpu.memory_space<vmem>>, vector<16x128xf32>,
    %c0_i32_14 = arith.constant 0 : i32
    %16 = arith.cmpi eq, %arg1, %c0_i32_14 : i32
    %17 = arith.extui %16 : i1 to i32
    %c0_i32_15 = arith.constant 0 : i32
    %18 = arith.cmpi ne, %17, %c0_i32_15 : i32
    scf.if %18 {
      %c0_16 = arith.constant 0 : index
      %c0_17 = arith.constant 0 : index
      %19 = vector.load %arg10[%c0_16, %c0_17] : memref<16x128xf32, #tpu.memory_space<vmem>>, vector<16x128xf32>
      %20 = arith.addf %3, %19 : vector<16x128xf32>
      %c0_18 = arith.constant 0 : index
      %c0_19 = arith.constant 0 : index
      %21 = vector.load %arg6[%c0_18, %c0_19] : memref<1x128xf32, #tpu.memory_space<vmem>>, vector<1x128xf32>
      %22 = vector.broadcast %21 : vector<1x128xf32> to vector<16x128xf32>
      %23 = arith.addf %20, %22 : vector<16x128xf32>
      %c0_20 = arith.constant 0 : index
      %c0_21 = arith.constant 0 : index
      %24 = vector.load %arg7[%c0_20, %c0_21] : memref<1x128xf32, #tpu.memory_space<vmem>>, vector<1x128xf32>
      %c0_22 = arith.constant 0 : index
      %c0_23 = arith.constant 0 : index
      %25 = vector.load %arg8[%c0_22, %c0_23] : memref<1x128xf32, #tpu.memory_space<vmem>>, vector<1x128xf32>
      %26 = tpu.iota {dimensions = array<i32: 1>} : vector<16x128xi32>
      %c32_i32 = arith.constant 32 : i32
      %27 = vector.broadcast %c32_i32 : i32 to vector<16x128xi32>
      %28 = arith.cmpi slt, %26, %27 : vector<16x128xi32>
      %cst_24 = arith.constant 0.000000e+00 : f32
      %29 = vector.broadcast %cst_24 : f32 to vector<16x128xf32>
      %30 = arith.select %28, %23, %29 : vector<16x128xi1>, vector<16x128xf32>
      %cst_25 = arith.constant dense<0.000000e+00> : vector<16xf32>
      %31 = vector.multi_reduction <add>, %30, %cst_25 [1] : vector<16x128xf32> to vector<16xf32>
      %32 = vector.shape_cast %31 : vector<16xf32> to vector<16x1xf32>
      %cst_26 = arith.constant 3.125000e-02 : f32
      %33 = vector.broadcast %cst_26 : f32 to vector<16x1xf32>
      %34 = arith.mulf %32, %33 : vector<16x1xf32>
      %35 = vector.broadcast %34 : vector<16x1xf32> to vector<16x128xf32>
      %36 = arith.subf %23, %35 : vector<16x128xf32>
      %cst_27 = arith.constant 0.000000e+00 : f32
      %37 = vector.broadcast %cst_27 : f32 to vector<16x128xf32>
      %38 = arith.select %28, %36, %37 : vector<16x128xi1>, vector<16x128xf32>
      %39 = arith.mulf %38, %38 : vector<16x128xf32>
      %cst_28 = arith.constant dense<0.000000e+00> : vector<16xf32>
      %40 = vector.multi_reduction <add>, %39, %cst_28 [1] : vector<16x128xf32> to vector<16xf32>
      %41 = vector.shape_cast %40 : vector<16xf32> to vector<16x1xf32>
      %cst_29 = arith.constant 3.125000e-02 : f32
      %42 = vector.broadcast %cst_29 : f32 to vector<16x1xf32>
      %43 = arith.mulf %41, %42 : vector<16x1xf32>
      %cst_30 = arith.constant 9.99999974E-6 : f32
      %44 = vector.broadcast %cst_30 : f32 to vector<16x1xf32>
      %45 = arith.addf %43, %44 : vector<16x1xf32>
      %46 = math.rsqrt %45 : vector<16x1xf32>
      %47 = vector.broadcast %46 : vector<16x1xf32> to vector<16x128xf32>
      %48 = arith.mulf %38, %47 : vector<16x128xf32>
      %49 = vector.broadcast %24 : vector<1x128xf32> to vector<16x128xf32>
      %50 = arith.mulf %48, %49 : vector<16x128xf32>
      %51 = vector.broadcast %25 : vector<1x128xf32> to vector<16x128xf32>
      %52 = arith.addf %50, %51 : vector<16x128xf32>
      %c0_31 = arith.constant 0 : index
      %c0_32 = arith.constant 0 : index
      %53 = vector.load %arg9[%c0_31, %c0_32] : memref<16x128xf32, #tpu.memory_space<vmem>>, vector<16x128xf32>
      tpu.vector_store %arg9[%c0_31, %c0_32], %52 {strides = array<i32>} : memref<16x128xf32, #tpu.memory_space<vmem>>, vector<16x128xf32>,
    } else {
    }
    return
  }
  func.func @transform_0(%arg0: i32, %arg1: i32) -> (i32, i32) {
    %c0_i32 = arith.constant 0 : i32
    %c0_i32_0 = arith.constant 0 : i32
    return %arg0, %c0_i32 : i32, i32
  }
  func.func @transform_1(%arg0: i32, %arg1: i32) -> (i32, i32) {
    %c0_i32 = arith.constant 0 : i32
    %c0_i32_0 = arith.constant 0 : i32
    return %c0_i32, %arg1 : i32, i32
  }
  func.func @transform_2(%arg0: i32, %arg1: i32) -> (i32, i32) {
    %c0_i32 = arith.constant 0 : i32
    %c0_i32_0 = arith.constant 0 : i32
    return %c0_i32, %arg1 : i32, i32
  }
  func.func @transform_3(%arg0: i32, %arg1: i32) -> (i32, i32) {
    %c0_i32 = arith.constant 0 : i32
    %c0_i32_0 = arith.constant 0 : i32
    return %arg1, %c0_i32 : i32, i32
  }
  func.func @transform_4(%arg0: i32, %arg1: i32) -> (i32, i32) {
    %c0_i32 = arith.constant 0 : i32
    %c0_i32_0 = arith.constant 0 : i32
    %c0_i32_1 = arith.constant 0 : i32
    return %c0_i32, %c0_i32_0 : i32, i32
  }
  func.func @transform_5(%arg0: i32, %arg1: i32) -> (i32, i32) {
    %c0_i32 = arith.constant 0 : i32
    %c0_i32_0 = arith.constant 0 : i32
    %c0_i32_1 = arith.constant 0 : i32
    return %c0_i32, %c0_i32_0 : i32, i32
  }
  func.func @transform_6(%arg0: i32, %arg1: i32) -> (i32, i32) {
    %c0_i32 = arith.constant 0 : i32
    %c0_i32_0 = arith.constant 0 : i32
    %c0_i32_1 = arith.constant 0 : i32
    return %c0_i32, %c0_i32_0 : i32, i32
  }
  func.func @transform_7(%arg0: i32, %arg1: i32) -> (i32, i32) {
    %c0_i32 = arith.constant 0 : i32
    %c0_i32_0 = arith.constant 0 : i32
    return %arg0, %c0_i32 : i32, i32
  }
}

</mosaic_0001>

<bundles_post_ra>
// kernel: tpu_custom_call.1
= control target key start
LH: loop header
LB: loop body
LE: loop exit
PB: predicated region body
PF: predicated region fallthrough
CT: control target
= control target key end

     0   :  { %12 = vsyncpa [#allocation4], 0  ;;  %s500_s0 = inlined_call_operand.hbm [shape: f32[16,128], index: 0, kind: input, shape index: {}]   ;;  %s501_s1 = inlined_call_operand.hbm [shape: f32[128,128], index: 1, kind: input, shape index: {}]   ;;  %s502_s2 = inlined_call_operand.vmem [shape: f32[1,128], index: 2, kind: input, shape index: {}]   ;;  %s503_s3 = inlined_call_operand.hbm [shape: f32[128,128], index: 3, kind: input, shape index: {}]   ;;  %s504_s4 = inlined_call_operand.vmem [shape: f32[1,128], index: 4, kind: input, shape index: {}]   ;;  %s505_s5 = inlined_call_operand.vmem [shape: f32[1,128], index: 5, kind: input, shape index: {}]   ;;  %s506_s6 = inlined_call_operand.vmem [shape: f32[1,128], index: 6, kind: input, shape index: {}]   ;;  %s507_s7 = inlined_call_operand.hbm [shape: f32[16,128], index: 7, kind: output, shape index: {}]  }
   0x1   :  { %13 = vsyncpa [#allocation7], 0 }
   0x2   :  { %14 = vsyncpa [#allocation5], 0  ;;  %s32_s26 = sshll.u32 %s501_s1, 4  ;;  %s414_s27 = smov [#allocation6]   ;;  %s33_s26 = int_to_ptr.hbm [resolvable:$true] %s32_s26 }
   0x3   :  { %s34_s28 = sshll.u32 %s414_s27, 4  ;;  %s19_s8 = sshll.u32 %s500_s0, 4  ;;  %s35_s28 = int_to_ptr.vmem [resolvable:$true] %s34_s28  ;;  %s20_s8 = int_to_ptr.hbm [resolvable:$true] %s19_s8 }
   0x4   :  { %s415_s9 = smov 128   ;;  %s416_s10 = smov 8  }
   0x5   :  { %40 = dma.hbm_to_vmem [thread:$0]  %s33_s26, 2048, %s35_s28, [#allocation7], %s415_s9, %s415_s9, %s416_s10  }
   0x6   :  { %s417_s11 = smov [#allocation3]   ;;  %s47_s1 = sshll.u32 %s503_s3, 4  ;;  %s48_s1 = int_to_ptr.hbm [resolvable:$true] %s47_s1 }
   0x7   :  { %s21_s12 = sshll.u32 %s417_s11, 4  ;;  %s418_s0 = smov [#allocation8]   ;;  %s22_s12 = int_to_ptr.vmem [resolvable:$true] %s21_s12 }
   0x8   :  { %27 = dma.hbm_to_vmem [thread:$0]  %s20_s8, 256, %s22_s12, [#allocation4], %s415_s9, %s415_s9, %s416_s10  }
   0x9   :  { %s49_s15 = sshll.u32 %s418_s0, 4  ;;  %s50_s15 = int_to_ptr.vmem [resolvable:$true] %s49_s15 }
   0xa   :  { %55 = dma.hbm_to_vmem [thread:$0]  %s48_s1, 2048, %s50_s15, [#allocation7], %s415_s9, %s415_s9, %s416_s10  }
   0xb   :  { %408 = dma.done.wait [#allocation4], 256  }
   0xc   :  { %409 = vsyncadd [#allocation4], 4294967040 }
   0xd   :  { %410 = dma.done.wait [#allocation7], 4096  }
   0xe   :  { %411 = vsyncadd [#allocation7], 4294963200  ;;  %v97_v0 = vld [vmem:[#allocation6 + $0x78] sm:$0xff]  ;;  %v96_v1 = vld [vmem:[#allocation6 + $0x70] sm:$0xff]  ;;  %v187_v41 = vlaneseq  ;;  %s252_s24 = sshll.u32 %s507_s7, 4  ;;  %s253_s24 = int_to_ptr.hbm [resolvable:$true] %s252_s24 }
   0xf   :  { %102 = vmatpush.msra.mxu0 %v97_v0  ;;  %266 = vmatpush.msra.mxu2 %v97_v0  ;;  %v95_v2 = vld [vmem:[#allocation6 + $0x68] sm:$0xff]  ;;  %v94_v3 = vld [vmem:[#allocation6 + $0x60] sm:$0xff]  ;;  %v93_v4 = vld [vmem:[#allocation6 + $0x58] sm:$0xff] }
  0x10   :  { %v144_v5 = vld [vmem:[#allocation8 + $0x78] sm:$0xff]  ;;  %v143_v6 = vld [vmem:[#allocation8 + $0x70] sm:$0xff]  ;;  %v142_v8 = vld [vmem:[#allocation8 + $0x68] sm:$0xff]  ;;  %v188_v42 = vand.u32 127, %v187_v41 }
  0x11   :  { %103 = vmatpush.msra.mxu0 %v96_v1  ;;  %267 = vmatpush.msra.mxu2 %v96_v1  ;;  %v92_v7 = vld [vmem:[#allocation6 + $0x50] sm:$0xff]  ;;  %v91_v9 = vld [vmem:[#allocation6 + $0x48] sm:$0xff]  ;;  %v141_v10 = vld [vmem:[#allocation8 + $0x60] sm:$0xff] }
  0x12   :  { %145 = vmatpush.msra.mxu1 %v144_v5  ;;  %282 = vmatpush.msra.mxu3 %v144_v5  ;;  %v90_v11 = vld [vmem:[#allocation6 + $0x40] sm:$0xff]  ;;  %v140_v12 = vld [vmem:[#allocation8 + $0x58] sm:$0xff]  ;;  %v139_v14 = vld [vmem:[#allocation8 + $0x50] sm:$0xff]  ;;  %vm189_vm0 = vcmp.lt.s32.totalorder %v188_v42, 32 }
  0x13   :  { %104 = vmatpush.msra.mxu0 %v95_v2  ;;  %268 = vmatpush.msra.mxu2 %v95_v2  ;;  %v89_v13 = vld [vmem:[#allocation6 + $0x38] sm:$0xff]  ;;  %v88_v15 = vld [vmem:[#allocation6 + $0x30] sm:$0xff]  ;;  %v138_v16 = vld [vmem:[#allocation8 + $0x48] sm:$0xff] }
  0x14   :  { %146 = vmatpush.msra.mxu1 %v143_v6  ;;  %283 = vmatpush.msra.mxu3 %v143_v6  ;;  %v87_v17 = vld [vmem:[#allocation6 + $0x28] sm:$0xff]  ;;  %v137_v18 = vld [vmem:[#allocation8 + $0x40] sm:$0xff]  ;;  %v136_v20 = vld [vmem:[#allocation8 + $0x38] sm:$0xff] }
  0x15   :  { %105 = vmatpush.msra.mxu0 %v94_v3  ;;  %269 = vmatpush.msra.mxu2 %v94_v3  ;;  %v86_v19 = vld [vmem:[#allocation6 + $0x20] sm:$0xff]  ;;  %v85_v21 = vld [vmem:[#allocation6 + $0x18] sm:$0xff]  ;;  %v135_v22 = vld [vmem:[#allocation8 + $0x30] sm:$0xff] }
  0x16   :  { %147 = vmatpush.msra.mxu1 %v142_v8  ;;  %284 = vmatpush.msra.mxu3 %v142_v8  ;;  %v84_v23 = vld [vmem:[#allocation6 + $0x10] sm:$0xff]  ;;  %v134_v24 = vld [vmem:[#allocation8 + $0x28] sm:$0xff]  ;;  %v133_v26 = vld [vmem:[#allocation8 + $0x20] sm:$0xff] }
  0x17   :  { %106 = vmatpush.msra.mxu0 %v93_v4  ;;  %270 = vmatpush.msra.mxu2 %v93_v4  ;;  %v83_v25 = vld [vmem:[#allocation6 + $0x8] sm:$0xff]  ;;  %v82_v27 = vld [vmem:[#allocation6] sm:$0xff]  ;;  %v80_v28 = vld [vmem:[#allocation3] sm:$0xff] }
  0x18   :  { %148 = vmatpush.msra.mxu1 %v141_v10  ;;  %285 = vmatpush.msra.mxu3 %v141_v10  ;;  %v81_v29 = vld [vmem:[#allocation3 + $0x8] sm:$0xff]  ;;  %v131_v31 = vld [vmem:[#allocation8 + $0x10] sm:$0xff]  ;;  %v130_v32 = vld [vmem:[#allocation8 + $0x8] sm:$0xff] }
  0x19   :  { %107 = vmatpush.msra.mxu0 %v92_v7  ;;  %271 = vmatpush.msra.mxu2 %v92_v7  ;;  %v132_v30 = vld [vmem:[#allocation8 + $0x18] sm:$0xff]  ;;  %v129_v33 = vld [vmem:[#allocation8] sm:$0xff]  ;;  %v304_v34 = vld [vmem:[%s502_s2] ss:$0 sm:$0xff] }
  0x1a   :  { %149 = vmatpush.msra.mxu1 %v140_v12  ;;  %286 = vmatpush.msra.mxu3 %v140_v12  ;;  %v305_v43 = vld [vmem:[%s504_s4] ss:$0 sm:$0xff] }
  0x1b   :  { %108 = vmatpush.msra.mxu0 %v91_v9  ;;  %272 = vmatpush.msra.mxu2 %v91_v9  ;;  %v306_v10 = vld [vmem:[%s505_s5] ss:$0 sm:$0xff]  ;;  %s419_s5 = smov [#allocation9]  }
  0x1c   :  { %150 = vmatpush.msra.mxu1 %v139_v14  ;;  %287 = vmatpush.msra.mxu3 %v139_v14  ;;  %v307_v14 = vld [vmem:[%s506_s6] ss:$0 sm:$0xff]  ;;  %s250_s21 = sshll.u32 %s419_s5, 4  ;;  %s251_s21 = int_to_ptr.vmem [resolvable:$true] %s250_s21 }
  0x1d   :  { %109 = vmatpush.msra.mxu0 %v90_v11  ;;  %273 = vmatpush.msra.mxu2 %v90_v11 }
  0x1e   :  { %151 = vmatpush.msra.mxu1 %v138_v16  ;;  %288 = vmatpush.msra.mxu3 %v138_v16 }
  0x1f   :  { %110 = vmatpush.msra.mxu0 %v89_v13  ;;  %274 = vmatpush.msra.mxu2 %v89_v13 }
  0x20   :  { %152 = vmatpush.msra.mxu1 %v137_v18  ;;  %289 = vmatpush.msra.mxu3 %v137_v18 }
  0x21   :  { %111 = vmatpush.msra.mxu0 %v88_v15  ;;  %275 = vmatpush.msra.mxu2 %v88_v15 }
  0x22   :  { %153 = vmatpush.msra.mxu1 %v136_v20  ;;  %290 = vmatpush.msra.mxu3 %v136_v20 }
  0x23   :  { %112 = vmatpush.msra.mxu0 %v87_v17  ;;  %276 = vmatpush.msra.mxu2 %v87_v17 }
  0x24   :  { %154 = vmatpush.msra.mxu1 %v135_v22  ;;  %291 = vmatpush.msra.mxu3 %v135_v22 }
  0x25   :  { %113 = vmatpush.msra.mxu0 %v86_v19  ;;  %277 = vmatpush.msra.mxu2 %v86_v19 }
  0x26   :  { %155 = vmatpush.msra.mxu1 %v134_v24  ;;  %292 = vmatpush.msra.mxu3 %v134_v24 }
  0x27   :  { %114 = vmatpush.msra.mxu0 %v85_v21  ;;  %278 = vmatpush.msra.mxu2 %v85_v21 }
  0x28   :  { %156 = vmatpush.msra.mxu1 %v133_v26  ;;  %293 = vmatpush.msra.mxu3 %v133_v26 }
  0x29   :  { %115 = vmatpush.msra.mxu0 %v84_v23  ;;  %279 = vmatpush.msra.mxu2 %v84_v23 }
  0x2a   :  { %157 = vmatpush.msra.mxu1 %v132_v30  ;;  %294 = vmatpush.msra.mxu3 %v132_v30 }
  0x2b   :  { %116 = vmatpush.msra.mxu0 %v83_v25  ;;  %280 = vmatpush.msra.mxu2 %v83_v25 }
  0x2c   :  { %158 = vmatpush.msra.mxu1 %v131_v31  ;;  %295 = vmatpush.msra.mxu3 %v131_v31 }
  0x2d   :  { %117 = vmatpush.msra.mxu0 %v82_v27  ;;  %281 = vmatpush.msra.mxu2 %v82_v27 }
  0x2e   :  { %118 = vmatmul.f32.vlgmr.msra.gmra.mxu0 %v80_v28  ;;  %121 = vmatmul.f32.vlgmr.msra.gmra.mxu2 %v81_v29 }
  0x2f   :  { %159 = vmatpush.msra.mxu1 %v130_v32  ;;  %296 = vmatpush.msra.mxu3 %v130_v32 }
  0x31   :  { %160 = vmatpush.msra.mxu1 %v129_v33  ;;  %297 = vmatpush.msra.mxu3 %v129_v33 }
  0xab   :  { %v119_v35 = vpop.f32.mrf.mxu0 }
  0xac   :  { %v120_v36 = vadd.f32 %v304_v34, %v119_v35 }
  0xae   :  { %v125_v37 = vmax.f32 %v120_v36, 0.0 }
  0xb0   :  { %161 = vmatmul.f32.vlgmr.msra.gmra.mxu1 %v125_v37 }
  0xb1   :  { %v122_v38 = vpop.f32.mrf.mxu2 }
  0xb2   :  { %v123_v39 = vadd.f32 %v304_v34, %v122_v38 }
  0xb4   :  { %v126_v40 = vmax.f32 %v123_v39, 0.0 }
  0xb6   :  { %164 = vmatmul.f32.vlgmr.msra.gmra.mxu3 %v126_v40 }
 0x12d   :  { %v162_v44 = vpop.f32.mrf.mxu1 }
 0x12e   :  { %v177_v45 = vadd.f32 %v162_v44, %v80_v28 }
 0x130   :  { %v183_v46 = vadd.f32 %v305_v43, %v177_v45 }
 0x132   :  { %v190_v47 = vsel %vm189_vm0, %v183_v46, 0.0 }
 0x133   :  { %192 = vadd.xlane.f32.xlu0 %v190_v47 }
 0x139   :  { %v165_v48 = vpop.f32.mrf.mxu3 }
 0x13a   :  { %v178_v49 = vadd.f32 %v165_v48, %v81_v29 }
 0x13c   :  { %v184_v50 = vadd.f32 %v305_v43, %v178_v49 }
 0x13e   :  { %v191_v51 = vsel %vm189_vm0, %v184_v50, 0.0 }
 0x13f   :  { %194 = vadd.xlane.f32.xlu0 %v191_v51 }
 0x1a6   :  { %v193_v52 = vpop.xlane.xlu0 %192 }
 0x1a7   :  { %v196_v53 = vmul.f32 0.03125, %v193_v52 }
 0x1a9   :  { %v198_v54 = vsub.f32 %v183_v46, %v196_v53 }
 0x1ab   :  { %v200_v55 = vsel %vm189_vm0, %v198_v54, 0.0 }
 0x1ac   :  { %v202_v56 = vmul.f32 %v200_v55, %v200_v55 }
 0x1ae   :  { %204 = vadd.xlane.f32.xlu1 %v202_v56 }
 0x1b2   :  { %v195_v57 = vpop.xlane.xlu0 %194 }
 0x1b3   :  { %v197_v58 = vmul.f32 0.03125, %v195_v57 }
 0x1b5   :  { %v199_v59 = vsub.f32 %v184_v50, %v197_v58 }
 0x1b7   :  { %v201_v60 = vsel %vm189_vm0, %v199_v59, 0.0 }
 0x1b8   :  { %v203_v61 = vmul.f32 %v201_v60, %v201_v60 }
 0x1ba   :  { %206 = vadd.xlane.f32.xlu1 %v203_v61 }
 0x221   :  { %v205_v62 = vpop.xlane.xlu1 %204 }
 0x222   :  { %v208_v63 = vmul.f32 0.03125, %v205_v62 }
 0x224   :  { %v210_v0 = vadd.f32 1e-05, %v208_v63 }
 0x226   :  { %308 = vrsqrt.f32 %v210_v0  ;;  %vm218_vm2 = vweird.f32 %v210_v0 }
 0x22c   :  { %v309_v1 = vpop.eup %308 }
 0x22d   :  { %v213_v2 = vmul.f32 %v309_v1, %v210_v0  ;;  %v207_v3 = vpop.xlane.xlu1 %206  ;;  %vm219_vm1 = vweird.f32 %v309_v1 }
 0x22e   :  { %v209_v4 = vmul.f32 0.03125, %v207_v3  ;;  %vm220_vm3 = vmor %vm218_vm2, %vm219_vm1 }
 0x22f   :  { %v214_v5 = vmul.f32 %v309_v1, %v213_v2 }
 0x230   :  { %v211_v6 = vadd.f32 1e-05, %v209_v4 }
 0x231   :  { %v215_v7 = vmul.f32 0.5, %v214_v5 }
 0x232   :  { %310 = vrsqrt.f32 %v211_v6  ;;  %vm228_vm5 = vweird.f32 %v211_v6 }
 0x233   :  { %v216_v8 = vsub.f32 1.5, %v215_v7 }
 0x235   :  { %v217_v9 = vmul.f32 %v309_v1, %v216_v8 }
 0x237   :  { %v221_v11 = vsel %vm220_vm3, %v309_v1, %v217_v9 }
 0x238   :  { %v311_v12 = vpop.eup %310  ;;  %v232_v13 = vmul.f32 %v221_v11, %v200_v55 }
 0x239   :  { %v223_v15 = vmul.f32 %v311_v12, %v211_v6  ;;  %vm229_vm4 = vweird.f32 %v311_v12 }
 0x23a   :  { %v237_v16 = vmul.f32 %v306_v10, %v232_v13  ;;  %vm230_vm6 = vmor %vm228_vm5, %vm229_vm4 }
 0x23b   :  { %v224_v17 = vmul.f32 %v311_v12, %v223_v15 }
 0x23c   :  { %v242_v18 = vadd.f32 %v307_v14, %v237_v16 }
 0x23d   :  { %v225_v19 = vmul.f32 0.5, %v224_v17 }
 0x23e   :  { %244 = vst [vmem:[#allocation9] sm:$0xff] %v242_v18 }
 0x23f   :  { %v226_v20 = vsub.f32 1.5, %v225_v19 }
 0x241   :  { %v227_v21 = vmul.f32 %v311_v12, %v226_v20 }
 0x243   :  { %v231_v22 = vsel %vm230_vm6, %v311_v12, %v227_v21 }
 0x244   :  { %v233_v23 = vmul.f32 %v231_v22, %v201_v60 }
 0x246   :  { %v238_v24 = vmul.f32 %v306_v10, %v233_v23 }
 0x248   :  { %v243_v25 = vadd.f32 %v307_v14, %v238_v24 }
 0x24a   :  { %245 = vst [vmem:[#allocation9 + $0x8] sm:$0xff] %v243_v25 }
 0x24b   :  { %258 = dma.vmem_to_hbm [thread:$0]  %s251_s21, 256, %s253_s24, [#allocation5], %s415_s9, %s415_s9, %s416_s10  }
 0x24c   :  { %412 = dma.done.wait [#allocation5], 256  }
 0x24d   :  { %413 = vsyncadd [#allocation5], 4294967040 }
 0x24e   :  { %263 = vsyncpa [#allocation4], 1 }
 0x24f   :  { %264 = vsyncpa [#allocation7], 1 }
 0x250   :  { %265 = vsyncpa [#allocation5], 1 }

</bundles_post_ra>
